<compile_context>
chip_gen: v6e
topology: v6e:2x2x1
jax: 0.10.0
libtpu: 0.0.40
codegen_flags: <defaults>
</compile_context>

<pallas_src>
import math

import jax
import jax.numpy as jnp
from jax.experimental import pallas as pl
from jax.experimental.pallas import tpu as pltpu

EPS = 1e-5
D_IN = 7
D_H = 32
D_OUT = 16
D_CAT = D_IN + D_OUT        # 23
D_STACK = D_H + D_IN        # 39 = [fc1(bn1 folded) ; attention] stacked rows

_LANE = 128
_MAX_TB = 32768             # keeps 2x-buffered VMEM footprint ~8 MiB


def _round_up(v, m):
    return ((v + m - 1) // m) * m


def _choose_tb(n):
    """Batch-tile (lane) width.

    Big tiles amortize the ~0.35 us/grid-step pipeline overhead; the tile is
    capped at 32768 lanes and at ~half the padded batch so the "parallel"
    grid axis has at least 2 steps (keeps both v7x TensorCores busy).
    """
    n128 = max(_LANE, _round_up(n, _LANE))
    if n128 <= 2 * _LANE:
        return n128
    return min(_MAX_TB, _round_up((n128 + 1) // 2, _LANE))


def _fused_kernel(x_ref,             # (7,  TB)  x^T tile, batch on lanes
                  wsa_ref, bsa_ref,  # (39, 7), (39, 1)  [W1'(bn1 folded); Wa]
                  w2_ref, b2_ref,    # (16, 32), (16, 1) fc2 with bn2 folded
                  out_ref):          # (23, TB)  rows 0:7 x_hu, rows 7:23 y
    x = x_ref[...]                                             # (7, TB) f32

    # One MXU push covers both K=7 matmuls (fc1' and attention share x).
    z = jnp.dot(wsa_ref[...], x,
                preferred_element_type=jnp.float32) + bsa_ref[...]  # (39, TB)
    h = jnp.maximum(z[:D_H, :], 0.0)      # fc1(bn1 x) -> relu, sublane-aligned
    logits = z[D_H:, :]                   # attention logits, aligned at row 32

    # softmax over the feature (sublane) axis; exact division — the kernel is
    # HBM-bound, the approximate EUP reciprocal buys no wall-clock.
    m = jnp.max(logits, axis=0, keepdims=True)
    e = jnp.exp(logits - m)
    w = e / jnp.sum(e, axis=0, keepdims=True)
    xhu = x * w + x                                            # (7, TB)

    # fc2 (bn2 folded); dropout == identity in eval mode.
    y = jnp.dot(w2_ref[...], h,
                preferred_element_type=jnp.float32) + b2_ref[...]   # (16, TB)

    # Single fused lane-dense store; no XLA-side concatenate needed.
    out_ref[...] = jnp.concatenate([xhu, y], axis=0).astype(out_ref.dtype)


def prepare_params(p):
    """Host-side, ONCE per model: fold eval-mode BatchNorm into the adjacent
    Linear layers and stack fc1' with the attention Linear.  Keep the result
    and reuse it across calls (do not re-derive per forward)."""
    a1 = p["bn1_g"] * jax.lax.rsqrt(p["bn1_v"] + EPS)          # (7,)
    c1 = p["bn1_b"] - p["bn1_m"] * a1
    w1f = p["w1"] * a1[None, :]                                # (32, 7)
    b1f = p["b1"] + p["w1"] @ c1                               # (32,)

    a2 = p["bn2_g"] * jax.lax.rsqrt(p["bn2_v"] + EPS)          # (32,)
    c2 = p["bn2_b"] - p["bn2_m"] * a2
    w2f = p["w2"] * a2[None, :]                                # (16, 32)
    b2f = p["b2"] + p["w2"] @ c2                               # (16,)

    # Row order [W1'; Wa] keeps the in-kernel slices 8-sublane aligned.
    wsa = jnp.concatenate([w1f, p["wa"]], axis=0)              # (39, 7)
    bsa = jnp.concatenate([b1f, p["ba"]], axis=0)[:, None]     # (39, 1)
    return {"wsa": wsa, "bsa": bsa, "w2f": w2f, "b2f": b2f[:, None]}


def _forward_stacked(x, kp, out_dtype=jnp.float32):
    """x: (N, 7) f32 -> (N, 23) via one gridded pallas_call."""
    n = x.shape[0]
    tb = _choose_tb(n)
    n_pad = _round_up(n, tb)

    # Feature-major + zero-pad the lane (batch) axis; XLA fuses the
    # cast/transpose/pad into a single copy in front of the custom call.
    xT = jnp.pad(x.astype(jnp.float32).T, ((0, 0), (0, n_pad - n)))

    out23 = pl.pallas_call(
        _fused_kernel,
        out_shape=jax.ShapeDtypeStruct((D_CAT, n_pad), out_dtype),
        grid=(n_pad // tb,),
        in_specs=[
            pl.BlockSpec((D_IN, tb), lambda i: (0, i)),        # x^T batch tiles
            pl.BlockSpec((D_STACK, D_IN), lambda i: (0, 0)),   # [W1'; Wa] resident
            pl.BlockSpec((D_STACK, 1), lambda i: (0, 0)),      # [b1'; ba]
            pl.BlockSpec((D_OUT, D_H), lambda i: (0, 0)),      # W2' (bn2 folded)
            pl.BlockSpec((D_OUT, 1), lambda i: (0, 0)),        # b2'
        ],
        out_specs=pl.BlockSpec((D_CAT, tb), lambda i: (0, i)),
        compiler_params=pltpu.CompilerParams(
            dimension_semantics=("parallel",)),
    )(xT, kp["wsa"], kp["bsa"], kp["w2f"], kp["b2f"])

    # One slice+transpose back to the PyTorch (N, 23) layout.  If the triplet
    # loss consumer accepts feature-major (23, N), return out23 directly and
    # drop this pass too.
    return out23[:, :n].T


@jax.jit
def triplet_forward(anchor, positive, negative, folded_params):
    """folded_params must come from prepare_params (computed once)."""
    x = jnp.concatenate([anchor, positive, negative], axis=0)  # (3B, 7)
    out = _forward_stacked(x, folded_params)                   # (3B, 23)
    b = anchor.shape[0]
    return out[:b], out[b:2 * b], out[2 * b:]


def init_params(key):
    ks = jax.random.split(key, 11)

    def linear(k, fan_in, fan_out):
        bound = 1.0 / math.sqrt(fan_in)
        kw, kb = jax.random.split(k)
        w = jax.random.uniform(kw, (fan_out, fan_in), jnp.float32, -bound, bound)
        b = jax.random.uniform(kb, (fan_out,), jnp.float32, -bound, bound)
        return w, b

    wa, ba = linear(ks[0], D_IN, D_IN)      # attention Linear(7, 7)
    w1, b1 = linear(ks[1], D_IN, D_H)       # fc1 Linear(7, 32)
    w2, b2 = linear(ks[2], D_H, D_OUT)      # fc2 Linear(32, 16)

    def bn(kg, kb, km, kv, nfeat):
        g = jax.random.uniform(kg, (nfeat,), jnp.float32, 0.5, 1.5)
        b = jax.random.uniform(kb, (nfeat,), jnp.float32, -0.5, 0.5)
        mean = jax.random.normal(km, (nfeat,), jnp.float32) * 0.1
        var = jax.random.uniform(kv, (nfeat,), jnp.float32, 0.5, 1.5)
        return g, b, mean, var

    bn1_g, bn1_b, bn1_m, bn1_v = bn(ks[3], ks[4], ks[5], ks[6], D_IN)
    bn2_g, bn2_b, bn2_m, bn2_v = bn(ks[7], ks[8], ks[9], ks[10], D_H)

    return {
        "wa": wa, "ba": ba, "w1": w1, "b1": b1, "w2": w2, "b2": b2,
        "bn1_g": bn1_g, "bn1_b": bn1_b, "bn1_m": bn1_m, "bn1_v": bn1_v,
        "bn2_g": bn2_g, "bn2_b": bn2_b, "bn2_m": bn2_m, "bn2_v": bn2_v,
    }


def _reference_once(x, p):
    """Pure-JAX reference mirroring the PyTorch module in eval() mode."""
    xn = (x - p["bn1_m"]) / jnp.sqrt(p["bn1_v"] + EPS) * p["bn1_g"] + p["bn1_b"]
    w = jax.nn.softmax(x @ p["wa"].T + p["ba"], axis=-1)
    x_hu = x * w + x
    h = jnp.maximum(xn @ p["w1"].T + p["b1"], 0.0)
    h = (h - p["bn2_m"]) / jnp.sqrt(p["bn2_v"] + EPS) * p["bn2_g"] + p["bn2_b"]
    y = h @ p["w2"].T + p["b2"]
    return jnp.concatenate([x_hu, y], axis=1)


if __name__ == "__main__":
    key = jax.random.PRNGKey(0)
    kparam, ka, kq, kn = jax.random.split(key, 4)

    params = init_params(kparam)
    folded = jax.tree_util.tree_map(jax.block_until_ready, prepare_params(params))

    B = 8
    anchor = jax.random.normal(ka, (B, D_IN), jnp.float32)
    positive = jax.random.normal(kq, (B, D_IN), jnp.float32)
    negative = jax.random.normal(kn, (B, D_IN), jnp.float32)

    outs = jax.block_until_ready(
        triplet_forward(anchor, positive, negative, folded))

    for x, o in zip((anchor, positive, negative), outs):
        ref = _reference_once(x, params)
        assert o.shape == (B, D_CAT)
        assert jnp.allclose(o, ref, atol=1e-4, rtol=1e-4), \
            "kernel output mismatch vs reference"

    print("KERNEL_OK")
</pallas_src>

<mosaic_0001>
module attributes {stable_mosaic.version = 11 : i64} {
  func.func @_fused_kernel(%arg0: i32, %arg1: memref<7x128xf32, #tpu.memory_space<vmem>>, %arg2: memref<39x7xf32, #tpu.memory_space<vmem>>, %arg3: memref<39x1xf32, #tpu.memory_space<vmem>>, %arg4: memref<16x32xf32, #tpu.memory_space<vmem>>, %arg5: memref<16x1xf32, #tpu.memory_space<vmem>>, %arg6: memref<23x128xf32, #tpu.memory_space<vmem>>) attributes {dimension_semantics = [#tpu.dimension_semantics<parallel>], iteration_bounds = array<i64: 1>, scalar_prefetch = 0 : i64, scratch_operands = 0 : i64, tpu.core_type = #tpu.core_type<tc>, window_params = [{transform_indices = @transform_0, window_bounds = array<i64: 7, 128>}, {pipeline_mode = #tpu.pipeline_mode<synchronous>, transform_indices = @transform_1, window_bounds = array<i64: 39, 7>}, {pipeline_mode = #tpu.pipeline_mode<synchronous>, transform_indices = @transform_2, window_bounds = array<i64: 39, 1>}, {pipeline_mode = #tpu.pipeline_mode<synchronous>, transform_indices = @transform_3, window_bounds = array<i64: 16, 32>}, {pipeline_mode = #tpu.pipeline_mode<synchronous>, transform_indices = @transform_4, window_bounds = array<i64: 16, 1>}, {transform_indices = @transform_5, window_bounds = array<i64: 23, 128>}]} {
    %c0 = arith.constant 0 : index
    %c0_0 = arith.constant 0 : index
    %0 = vector.load %arg1[%c0, %c0_0] : memref<7x128xf32, #tpu.memory_space<vmem>>, vector<7x128xf32>
    %c0_1 = arith.constant 0 : index
    %c0_2 = arith.constant 0 : index
    %1 = vector.load %arg2[%c0_1, %c0_2] : memref<39x7xf32, #tpu.memory_space<vmem>>, vector<39x7xf32>
    %cst = arith.constant dense<0.000000e+00> : vector<39x128xf32>
    %2 = tpu.matmul %1, %0, %cst {dimension_numbers = #tpu.dot_dimension_numbers<[1], [0], [0], [1], [0, 0, 1, 1], [], []>} : vector<39x7xf32>, vector<7x128xf32>, vector<39x128xf32> -> vector<39x128xf32>
    %c0_3 = arith.constant 0 : index
    %c0_4 = arith.constant 0 : index
    %3 = vector.load %arg3[%c0_3, %c0_4] : memref<39x1xf32, #tpu.memory_space<vmem>>, vector<39x1xf32>
    %4 = vector.broadcast %3 : vector<39x1xf32> to vector<39x128xf32>
    %5 = arith.addf %2, %4 : vector<39x128xf32>
    %6 = vector.extract_strided_slice %5 {offsets = [0, 0], sizes = [32, 128], strides = [1, 1]} : vector<39x128xf32> to vector<32x128xf32>
    %cst_5 = arith.constant 0.000000e+00 : f32
    %7 = vector.broadcast %cst_5 : f32 to vector<32x128xf32>
    %8 = arith.maximumf %6, %7 : vector<32x128xf32>
    %9 = vector.extract_strided_slice %5 {offsets = [32, 0], sizes = [7, 128], strides = [1, 1]} : vector<39x128xf32> to vector<7x128xf32>
    %cst_6 = arith.constant dense<0xFF800000> : vector<128xf32>
    %10 = vector.multi_reduction <maximumf>, %9, %cst_6 [0] : vector<7x128xf32> to vector<128xf32>
    %11 = vector.shape_cast %10 : vector<128xf32> to vector<1x128xf32>
    %12 = vector.broadcast %11 : vector<1x128xf32> to vector<7x128xf32>
    %13 = arith.subf %9, %12 : vector<7x128xf32>
    %14 = math.exp %13 : vector<7x128xf32>
    %cst_7 = arith.constant dense<0.000000e+00> : vector<128xf32>
    %15 = vector.multi_reduction <add>, %14, %cst_7 [0] : vector<7x128xf32> to vector<128xf32>
    %16 = vector.shape_cast %15 : vector<128xf32> to vector<1x128xf32>
    %17 = vector.broadcast %16 : vector<1x128xf32> to vector<7x128xf32>
    %18 = arith.divf %14, %17 : vector<7x128xf32>
    %19 = arith.mulf %0, %18 : vector<7x128xf32>
    %20 = arith.addf %19, %0 : vector<7x128xf32>
    %c0_8 = arith.constant 0 : index
    %c0_9 = arith.constant 0 : index
    %21 = vector.load %arg4[%c0_8, %c0_9] : memref<16x32xf32, #tpu.memory_space<vmem>>, vector<16x32xf32>
    %cst_10 = arith.constant dense<0.000000e+00> : vector<16x128xf32>
    %22 = tpu.matmul %21, %8, %cst_10 {dimension_numbers = #tpu.dot_dimension_numbers<[1], [0], [0], [1], [0, 0, 1, 1], [], []>} : vector<16x32xf32>, vector<32x128xf32>, vector<16x128xf32> -> vector<16x128xf32>
    %c0_11 = arith.constant 0 : index
    %c0_12 = arith.constant 0 : index
    %23 = vector.load %arg5[%c0_11, %c0_12] : memref<16x1xf32, #tpu.memory_space<vmem>>, vector<16x1xf32>
    %24 = vector.broadcast %23 : vector<16x1xf32> to vector<16x128xf32>
    %25 = arith.addf %22, %24 : vector<16x128xf32>
    %26 = tpu.concatenate %20, %25 in 0 : vector<7x128xf32>, vector<16x128xf32> -> vector<23x128xf32>
    %c0_13 = arith.constant 0 : index
    %c0_14 = arith.constant 0 : index
    %27 = vector.load %arg6[%c0_13, %c0_14] : memref<23x128xf32, #tpu.memory_space<vmem>>, vector<23x128xf32>
    tpu.vector_store %arg6[%c0_13, %c0_14], %26 {strides = array<i32>} : memref<23x128xf32, #tpu.memory_space<vmem>>, vector<23x128xf32>,
    return
  }
  func.func @transform_0(%arg0: i32) -> (i32, i32) {
    %c0_i32 = arith.constant 0 : i32
    %c0_i32_0 = arith.constant 0 : i32
    return %c0_i32, %arg0 : i32, i32
  }
  func.func @transform_1(%arg0: i32) -> (i32, i32) {
    %c0_i32 = arith.constant 0 : i32
    %c0_i32_0 = arith.constant 0 : i32
    %c0_i32_1 = arith.constant 0 : i32
    return %c0_i32, %c0_i32_0 : i32, i32
  }
  func.func @transform_2(%arg0: i32) -> (i32, i32) {
    %c0_i32 = arith.constant 0 : i32
    %c0_i32_0 = arith.constant 0 : i32
    %c0_i32_1 = arith.constant 0 : i32
    return %c0_i32, %c0_i32_0 : i32, i32
  }
  func.func @transform_3(%arg0: i32) -> (i32, i32) {
    %c0_i32 = arith.constant 0 : i32
    %c0_i32_0 = arith.constant 0 : i32
    %c0_i32_1 = arith.constant 0 : i32
    return %c0_i32, %c0_i32_0 : i32, i32
  }
  func.func @transform_4(%arg0: i32) -> (i32, i32) {
    %c0_i32 = arith.constant 0 : i32
    %c0_i32_0 = arith.constant 0 : i32
    %c0_i32_1 = arith.constant 0 : i32
    return %c0_i32, %c0_i32_0 : i32, i32
  }
  func.func @transform_5(%arg0: i32) -> (i32, i32) {
    %c0_i32 = arith.constant 0 : i32
    %c0_i32_0 = arith.constant 0 : i32
    return %c0_i32, %arg0 : i32, i32
  }
}

</mosaic_0001>

<bundles_post_ra>
// kernel: triplet_forward.1
= control target key start
LH: loop header
LB: loop body
LE: loop exit
PB: predicated region body
PF: predicated region fallthrough
CT: control target
= control target key end

     0   :  { %vm72_vm0 = vcmask 1046528   ;;  %v362_v0 = vmov 0.0   ;;  %vm56_vm1 = vcmask 56320   ;;  %vm363_vm2 = vmmov 0   ;;  %s473_s0 = inlined_call_operand.vmem [shape: f32[7,128], index: 0, kind: input, shape index: {}]   ;;  %s474_s1 = inlined_call_operand.vmem [shape: f32[39,7], index: 1, kind: input, shape index: {}]   ;;  %s475_s2 = inlined_call_operand.vmem [shape: f32[39,1], index: 2, kind: input, shape index: {}]   ;;  %s476_s4 = inlined_call_operand.vmem [shape: f32[16,1], index: 4, kind: input, shape index: {}]   ;;  %s477_s3 = inlined_call_operand.vmem [shape: f32[16,32], index: 3, kind: input, shape index: {}]   ;;  %s478_s5 = inlined_call_operand.vmem [shape: f32[23,128], index: 5, kind: output, shape index: {}]  }
   0x1   :  { %323 = vmatprep.subr.mxu0 %v362_v0  ;;  %351 = vmatprep.subr.mxu1 %v362_v0  ;;  %v398_v1 = vld [vmem:[%s473_s0] sm:$0x7f]  ;;  %v24_v3 = vld [vmem:[%s474_s1 + $0x18] sm:$0xff]  ;;  %v27_v5 = vld [vmem:[%s475_s2 + $0x8] sm:$0xff]  ;;  %v364_v8 = vmov 0   ;;  %vm205_vm3 = vcmask 261120  }
   0x2   :  { %v21_v2 = vld [vmem:[%s474_s1] sm:$0xff]  ;;  %324 = vmatpush3.msk.msra.mxu0 %vm72_vm0, %v398_v1  ;;  %352 = vmatpush3.msk.msra.mxu1 %vm72_vm0, %v398_v1  ;;  %v29_v4 = vld [vmem:[%s475_s2 + $0x18] sm:$0xff]  ;;  %v22_v6 = vld [vmem:[%s474_s1 + $0x8] sm:$0xff] }
   0x3   :  { %325 = vmatprep.mubr.msk.f32.mxu0 %vm363_vm2, %v362_v0  ;;  %334 = vmatprep.mubr.msk.f32.mxu1 %vm363_vm2, %v362_v0  ;;  %v25_v7 = vld [vmem:[%s474_s1 + $0x20] sm:$0x7f]  ;;  %v28_v9 = vld [vmem:[%s475_s2 + $0x10] sm:$0xff]  ;;  %v194_v14 = vld [vmem:[%s476_s4 + $0x8] sm:$0xff] }
   0x4   :  { %326 = vmatmul.mubr.msk.f32.vlgmr.msra.gmra.mxu0 %vm56_vm1, %v21_v2  ;;  %335 = vmatmul.mubr.msk.f32.vlgmr.msra.gmra.mxu1 %vm56_vm1, %v24_v3  ;;  %v26_v10 = vld [vmem:[%s475_s2] sm:$0xff]  ;;  %v23_v11 = vld [vmem:[%s474_s1 + $0x10] sm:$0xff]  ;;  %v192_v38 = vld [vmem:[%s477_s3 + $0x8] sm:$0xff] }
   0x5   :  { %328 = vmatprep.mubr.msk.f32.mxu0 %vm363_vm2, %v362_v0  ;;  %337 = vmatprep.mubr.msk.f32.mxu1 %vm363_vm2, %v362_v0  ;;  %v30_v12 = vld [vmem:[%s475_s2 + $0x20] sm:$0x7f] }
   0x6   :  { %356 = vset.pattern.permute.xlu0 %v364_v8  ;;  %357 = vset.pattern.permute.xlu1 %v364_v8  ;;  %v193_v13 = vld [vmem:[%s476_s4] sm:$0xff] }
   0x7   :  { %48 = vperm.xlu0 %356, %v29_v4   ;;  %38 = vperm.xlu1 %357, %v27_v5   ;;  %v191_v15 = vld [vmem:[%s477_s3] sm:$0xff] }
   0x8   :  { %329 = vmatmul.mubr.msk.f32.gmra.mxu0 %vm56_vm1, %v22_v6  ;;  %338 = vmatmul.mubr.msk.f32.gmra.mxu1 %vm56_vm1, %v25_v7 }
   0x9   :  { %331 = vmatprep.mubr.msk.f32.mxu0 %vm363_vm2, %v362_v0  ;;  %348 = vmatprep.mubr.msk.f32.mxu1 %vm205_vm3, %v191_v15 }
   0xb   :  { %43 = vperm.xlu0 %356, %v28_v9   ;;  %33 = vperm.xlu1 %357, %v26_v10  }
   0xc   :  { %332 = vmatmul.mubr.msk.f32.gmra.mxu0 %vm56_vm1, %v23_v11 }
   0xf   :  { %53 = vperm.xlu0 %356, %v30_v12   ;;  %197 = vperm.xlu1 %357, %v193_v13  }
  0x13   :  { %202 = vperm.xlu0 %356, %v194_v14  }
  0x82   :  { %v49_v16 = vpop.permute.xlu0 %48  ;;  %v39_v19 = vpop.permute.xlu1 %38 }
  0x86   :  { %v44_v28 = vpop.permute.xlu0 %43  ;;  %v34_v29 = vpop.permute.xlu1 %33 }
  0x8a   :  { %v54_v39 = vpop.permute.xlu0 %53  ;;  %v198_v0 = vpop.permute.xlu1 %197 }
  0x8e   :  { %v203_v60 = vpop.permute.xlu0 %202 }
  0xc4   :  { %v142_v17 = vpop.f32.mrf.mxu0  ;;  %v157_v18 = vpop.f32.mrf.mxu1 }
  0xc5   :  { %v158_v20 = vadd.f32 %v157_v18, %v49_v16  ;;  %v143_v34 = vadd.f32 %v142_v17, %v34_v29 }
  0xc6   :  { %v327_v21 = vpop.f32.mrf.mxu0  ;;  %v336_v22 = vpop.f32.mrf.mxu1 }
  0xc7   :  { %v169_v23 = vmax.f32 %v158_v20, 0.0  ;;  %v166_v37 = vmax.f32 %v143_v34, 0.0 }
  0xc8   :  { %v147_v24 = vpop.f32.mrf.mxu0  ;;  %v162_v25 = vpop.f32.mrf.mxu1 }
  0xc9   :  { %340 = vmatprep.subr.mxu1 %v169_v23  ;;  %v148_v31 = vadd.f32 %v147_v24, %v39_v19  ;;  %v163_v40 = vadd.f32 %v162_v25, %v54_v39 }
  0xca   :  { %v330_v26 = vpop.f32.mrf.mxu0  ;;  %341 = vmatpush3.msra.mxu1 %v169_v23  ;;  %v339_v27 = vpop.f32.mrf.mxu1 }
  0xcb   :  { %v167_v36 = vmax.f32 %v148_v31, 0.0  ;;  %v170_v41 = vsel %vm72_vm0, %v163_v40, -inf }
  0xcc   :  { %v152_v30 = vpop.f32.mrf.mxu0  ;;  %v171_v42 = vrot.slane %v170_v41, 4 }
  0xcd   :  { %v153_v32 = vadd.f32 %v152_v30, %v44_v28 }
  0xce   :  { %v333_v33 = vpop.f32.mrf.mxu0  ;;  %v172_v43 = vmax.f32 %v170_v41, %v171_v42 }
  0xcf   :  { %v168_v35 = vmax.f32 %v153_v32, 0.0 }
  0xd0   :  { %v173_v44 = vrot.slane %v172_v43, 2 }
  0xd1   :  { %342 = vmatprep.subr.mxu1 %v168_v35 }
  0xd2   :  { %343 = vmatpush3.msra.mxu1 %v168_v35  ;;  %v174_v45 = vmax.f32 %v172_v43, %v173_v44 }
  0xd3   :  { %344 = vmatprep.subr.mxu1 %v167_v36 }
  0xd4   :  { %345 = vmatpush3.msra.mxu1 %v167_v36  ;;  %v175_v46 = vrot.slane %v174_v45, 1 }
  0xd5   :  { %346 = vmatprep.subr.mxu1 %v166_v37 }
  0xd6   :  { %347 = vmatpush3.msra.mxu1 %v166_v37  ;;  %v176_v47 = vmax.f32 %v174_v45, %v175_v46 }
  0xd7   :  { %349 = vmatmul.mubr.msk.f32.vlgmr.msra.gmra.mxu1 %vm205_vm3, %v192_v38 }
  0xd8   :  { %v177_v48 = vsub.f32 %v163_v40, %v176_v47 }
  0xda   :  { %v178_v49 = vmul.f32 1.442695, %v177_v48 }
  0xdc   :  { %358 = vpow2.f32 %v178_v49 }
  0xe9   :  { %v359_v50 = vpop.eup %358 }
  0xea   :  { %v180_v51 = vsel %vm72_vm0, %v359_v50, 0.0 }
  0xeb   :  { %v181_v52 = vrot.slane %v180_v51, 4 }
  0xed   :  { %v182_v53 = vadd.f32 %v181_v52, %v180_v51 }
  0xef   :  { %v183_v54 = vrot.slane %v182_v53, 2 }
  0xf1   :  { %v184_v55 = vadd.f32 %v183_v54, %v182_v53 }
  0xf3   :  { %v185_v56 = vrot.slane %v184_v55, 1 }
  0xf5   :  { %v186_v57 = vadd.f32 %v185_v56, %v184_v55 }
  0xf7   :  { %360 = vrcp.f32 %v186_v57 }
 0x104   :  { %v361_v58 = vpop.eup %360 }
 0x105   :  { %v188_v59 = vmul.f32 %v361_v58, %v359_v50 }
 0x107   :  { %v189_v63 = vmul.f32 %v188_v59, %v398_v1 }
 0x109   :  { %v190_v5 = vadd.f32 %v189_v63, %v398_v1 }
 0x197   :  { %v350_v61 = vpop.f32.mrf.mxu1 }
 0x198   :  { %v284_v62 = vadd.f32 %v350_v61, %v203_v60 }
 0x199   :  { %v278_v2 = vpop.f32.mrf.mxu1 }
 0x19a   :  { %v290_v3 = vrot.slane %v284_v62, 1  ;;  %v279_v4 = vadd.f32 %v278_v2, %v198_v0 }
 0x19c   :  { %298 = vst [vmem:[%s478_s5 + $0x10] sm:$0x7f] %v290_v3  ;;  %v289_v6 = vrot.slane %v279_v4, 1 }
 0x19e   :  { %v291_v7 = vsel %vm72_vm0, %v289_v6, %v290_v3  ;;  %v295_v8 = vsel %vm72_vm0, %v190_v5, %v289_v6 }
 0x19f   :  { %296 = vst [vmem:[%s478_s5] sm:$0xff] %v295_v8  ;;  %297 = vst [vmem:[%s478_s5 + $0x8] sm:$0xff] %v291_v7 }

</bundles_post_ra>
